<compile_context>
chip_gen: v6e
topology: v6e:2x2x1
jax: 0.10.0
libtpu: 0.0.40
codegen_flags: <defaults>
</compile_context>

<pallas_src>
import jax
import jax.numpy as jnp
from jax.experimental import pallas as pl
from jax.experimental.pallas import tpu as pltpu


def _round_up(x, m):
    return ((x + m - 1) // m) * m


def _autoencoder_kernel(x_ref, we_ref, be_ref, wd_ref, bd_ref,
                        lat_ref, rec_ref):
    # Encoder: latent = relu(x @ W_enc + b_enc).
    # x arrives in its original dtype (f32) and is cast to the bf16 compute
    # dtype here (VPU) -- avoids a separate XLA cast/pad pass over x in HBM.
    x = x_ref[...].astype(we_ref.dtype)                          # (TB, Din)
    z = jnp.dot(x, we_ref[...], preferred_element_type=jnp.float32)
    lat = jnp.maximum(z + be_ref[...], 0.0)                      # f32 bias+ReLU
    lat_ref[...] = lat.astype(lat_ref.dtype)                     # bf16 writeback

    # Decoder: reconstructed = latent @ W_dec + b_dec (no activation).
    r = jnp.dot(lat.astype(wd_ref.dtype), wd_ref[...],
                preferred_element_type=jnp.float32)
    rec_ref[...] = (r + bd_ref[...]).astype(rec_ref.dtype)


def prepare_params(w_enc, b_enc, w_dec, b_dec, compute_dtype=jnp.bfloat16):
    """One-time weight prep (outside the hot path): transpose from PyTorch
    (out, in) layout to (in, out), zero-pad the LATENT dim to a multiple of
    128 (exact: padded weight cols/rows are zero), and cast matmul operands to
    bf16.  The input feature dim is left unpadded so x needs no per-call copy.

    w_enc: (latent_dim, input_dim)   b_enc: (latent_dim,)
    w_dec: (input_dim, latent_dim)   b_dec: (input_dim,)
    """
    latent_dim, input_dim = w_enc.shape
    assert w_dec.shape == (input_dim, latent_dim)
    d_lat_p = _round_up(latent_dim, 128)

    we = jnp.zeros((input_dim, d_lat_p), compute_dtype)
    we = we.at[:, :latent_dim].set(w_enc.T.astype(compute_dtype))   # (Din, Lp)
    wd = jnp.zeros((d_lat_p, input_dim), compute_dtype)
    wd = wd.at[:latent_dim, :].set(w_dec.T.astype(compute_dtype))   # (Lp, Din)
    be = jnp.zeros((1, d_lat_p), jnp.float32)
    be = be.at[0, :latent_dim].set(b_enc.astype(jnp.float32))
    bd = b_dec.astype(jnp.float32).reshape(1, input_dim)

    return dict(we=we, be=be, wd=wd, bd=bd,
                input_dim=input_dim, latent_dim=latent_dim,
                compute_dtype=compute_dtype)


def _vmem_capacity_bytes():
    """Generation-aware VMEM capacity (v5e/v6e: 128 MiB, v7x: 64 MiB)."""
    try:
        return int(pltpu.get_tpu_info().vmem_capacity_bytes)
    except Exception:
        return 64 * 1024 * 1024   # conservative fallback (v7x per-TensorCore)


def _pick_batch_tile(batch, input_dim, d_lat_p, in_bytes, w_bytes, vmem_cap):
    """Largest batch tile that keeps (single-buffered resident weights +
    double-buffered activation tiles + f32 intermediates) inside a
    generation-aware VMEM budget."""
    budget = int(vmem_cap * 0.6)
    # Weights/biases are single-buffered (pl.Buffered(1) on their BlockSpecs).
    resident = 2 * input_dim * d_lat_p * w_bytes + (d_lat_p + input_dim) * 4
    # Per batch-row: double-buffered x (in dtype), latent out (bf16),
    # reconstruction out (f32), plus f32 compute intermediates.
    per_row = (2 * (input_dim * in_bytes + d_lat_p * 2 + input_dim * 4)
               + (d_lat_p * 4 + input_dim * 4))

    avail = budget - resident
    if avail < 8 * per_row:
        # TODO(synk): K-tiled fallback (tile input_dim as a trailing
        # "arbitrary" grid axis with an f32 VMEM accumulator) for weight pairs
        # too large to stay resident -- matters mainly on v7x's 64 MiB VMEM.
        avail = 8 * per_row

    tb = avail // per_row
    tb = min(tb, 1024, _round_up(batch, 8))
    # Keep >= 2 grid steps for large batches so v7x's 2 TensorCores both get
    # work from the "parallel" batch axis.
    if batch >= 512:
        tb = min(tb, _round_up(-(-batch // 2), 256))
    # 256-align when large (v6e/v7x MXU is 256x256); 8-align (sublanes) below.
    if tb >= 256:
        tb = (tb // 256) * 256
    else:
        tb = max(8, (tb // 8) * 8)
    if batch < 8:
        tb = batch          # block == full array dim is always legal
    return int(tb)


def simple_autoencoder_prepared(x, params):
    """Forward pass: returns (latent, reconstructed) of shapes
    (B, latent_dim) / (B, input_dim), both float32 (matching the PyTorch
    module).  x is consumed as-is -- no wrapper-side pad/cast copy."""
    input_dim = params["input_dim"]
    latent_dim = params["latent_dim"]
    we, be, wd, bd = params["we"], params["be"], params["wd"], params["bd"]
    d_lat_p = we.shape[1]

    B = x.shape[0]
    assert x.shape[1] == input_dim

    in_bytes = x.dtype.itemsize
    w_bytes = we.dtype.itemsize
    vmem_cap = _vmem_capacity_bytes()
    tb = _pick_batch_tile(B, input_dim, d_lat_p, in_bytes, w_bytes, vmem_cap)
    n_tiles = pl.cdiv(B, tb)          # ragged last tile -> masked stores

    flops = 4 * B * input_dim * d_lat_p             # two matmuls, 2*M*K*N each
    bytes_accessed = (x.size * in_bytes
                      + (we.size + wd.size) * w_bytes
                      + (be.size + bd.size) * 4
                      + B * d_lat_p * 2             # bf16 latent writeback
                      + B * input_dim * 4)          # f32 reconstruction

    resident = pl.Buffered(1)   # constant index_map -> one VMEM buffer each
    lat_p, rec = pl.pallas_call(
        _autoencoder_kernel,
        out_shape=(
            jax.ShapeDtypeStruct((B, d_lat_p), jnp.bfloat16),   # latent (bf16)
            jax.ShapeDtypeStruct((B, input_dim), jnp.float32),  # reconstruction
        ),
        grid=(n_tiles,),
        in_specs=[
            pl.BlockSpec((tb, input_dim), lambda i: (i, 0)),                 # x tile
            pl.BlockSpec((input_dim, d_lat_p), lambda i: (0, 0),
                         pipeline_mode=resident),                           # W_enc
            pl.BlockSpec((1, d_lat_p), lambda i: (0, 0),
                         pipeline_mode=resident),                           # b_enc
            pl.BlockSpec((d_lat_p, input_dim), lambda i: (0, 0),
                         pipeline_mode=resident),                           # W_dec
            pl.BlockSpec((1, input_dim), lambda i: (0, 0),
                         pipeline_mode=resident),                           # b_dec
        ],
        out_specs=(
            pl.BlockSpec((tb, d_lat_p), lambda i: (i, 0)),                   # latent
            pl.BlockSpec((tb, input_dim), lambda i: (i, 0)),                 # rec
        ),
        compiler_params=pltpu.CompilerParams(
            dimension_semantics=("parallel",),
            vmem_limit_bytes=int(vmem_cap * 0.85)),
        cost_estimate=pl.CostEstimate(
            flops=flops, transcendentals=0, bytes_accessed=bytes_accessed),
    )(x, we, be, wd, bd)

    # Latent: strip latent-dim padding and restore the module's f32 dtype
    # (tiny array; the decoder already consumed it as bf16 inside the kernel).
    latent = lat_p[:, :latent_dim].astype(jnp.float32)
    return latent, rec


def simple_autoencoder(x, w_enc, b_enc, w_dec, b_dec,
                       compute_dtype=jnp.bfloat16):
    """Convenience wrapper (prep + call). In a real hot path, call
    prepare_params() once and reuse simple_autoencoder_prepared()."""
    params = prepare_params(w_enc, b_enc, w_dec, b_dec, compute_dtype)
    return simple_autoencoder_prepared(x, params)


def _init_linear(key, out_features, in_features):
    # PyTorch nn.Linear default init: U(-1/sqrt(fan_in), 1/sqrt(fan_in))
    kw, kb = jax.random.split(key)
    bound = 1.0 / (in_features ** 0.5)
    w = jax.random.uniform(kw, (out_features, in_features), jnp.float32,
                           minval=-bound, maxval=bound)
    b = jax.random.uniform(kb, (out_features,), jnp.float32,
                           minval=-bound, maxval=bound)
    return w, b


if __name__ == "__main__":
    B, INPUT_DIM, LATENT_DIM = 8, 64, 16

    key = jax.random.PRNGKey(0)
    k_x, k_enc, k_dec = jax.random.split(key, 3)

    x = jax.random.normal(k_x, (B, INPUT_DIM), jnp.float32)
    w_enc, b_enc = _init_linear(k_enc, LATENT_DIM, INPUT_DIM)
    w_dec, b_dec = _init_linear(k_dec, INPUT_DIM, LATENT_DIM)

    params = prepare_params(w_enc, b_enc, w_dec, b_dec)
    latent, rec = simple_autoencoder_prepared(x, params)
    jax.block_until_ready((latent, rec))

    assert latent.shape == (B, LATENT_DIM) and rec.shape == (B, INPUT_DIM)
    assert latent.dtype == jnp.float32 and rec.dtype == jnp.float32

    # Identical-math reference: bf16 operands, f32 accumulation, bf16 latent.
    xb = x.astype(jnp.bfloat16)
    lat_f32 = jnp.maximum(
        jnp.dot(xb, w_enc.T.astype(jnp.bfloat16),
                preferred_element_type=jnp.float32) + b_enc, 0.0)
    lat_bf16 = lat_f32.astype(jnp.bfloat16)
    rec_ref = jnp.dot(lat_bf16, w_dec.T.astype(jnp.bfloat16),
                      preferred_element_type=jnp.float32) + b_dec
    assert jnp.allclose(latent, lat_bf16.astype(jnp.float32),
                        atol=2e-2, rtol=2e-2)
    assert jnp.allclose(rec, rec_ref, atol=2e-2, rtol=2e-2)

    # Also close to the full-f32 PyTorch-equivalent forward.
    lat_full = jnp.maximum(x @ w_enc.T + b_enc, 0.0)
    rec_full = lat_full @ w_dec.T + b_dec
    assert jnp.allclose(latent, lat_full, atol=5e-2, rtol=5e-2)
    assert jnp.allclose(rec, rec_full, atol=5e-2, rtol=5e-2)

    print("KERNEL_OK")
</pallas_src>

<mosaic_0001>
module attributes {stable_mosaic.version = 11 : i64} {
  func.func @_autoencoder_kernel(%arg0: i32, %arg1: memref<8x64xf32, #tpu.memory_space<vmem>>, %arg2: memref<64x128xbf16, #tpu.memory_space<vmem>>, %arg3: memref<1x128xf32, #tpu.memory_space<vmem>>, %arg4: memref<128x64xbf16, #tpu.memory_space<vmem>>, %arg5: memref<1x64xf32, #tpu.memory_space<vmem>>, %arg6: memref<8x128xbf16, #tpu.memory_space<vmem>>, %arg7: memref<8x64xf32, #tpu.memory_space<vmem>>) attributes {dimension_semantics = [#tpu.dimension_semantics<parallel>], iteration_bounds = array<i64: 1>, scalar_prefetch = 0 : i64, scratch_operands = 0 : i64, tpu.core_type = #tpu.core_type<tc>, window_params = [{transform_indices = @transform_0, window_bounds = array<i64: 8, 64>}, {pipeline_mode = #tpu.pipeline_mode<synchronous>, transform_indices = @transform_1, window_bounds = array<i64: 64, 128>}, {pipeline_mode = #tpu.pipeline_mode<synchronous>, transform_indices = @transform_2, window_bounds = array<i64: 1, 128>}, {pipeline_mode = #tpu.pipeline_mode<synchronous>, transform_indices = @transform_3, window_bounds = array<i64: 128, 64>}, {pipeline_mode = #tpu.pipeline_mode<synchronous>, transform_indices = @transform_4, window_bounds = array<i64: 1, 64>}, {transform_indices = @transform_5, window_bounds = array<i64: 8, 128>}, {transform_indices = @transform_6, window_bounds = array<i64: 8, 64>}]} {
    %c0 = arith.constant 0 : index
    %c0_0 = arith.constant 0 : index
    %0 = vector.load %arg1[%c0, %c0_0] : memref<8x64xf32, #tpu.memory_space<vmem>>, vector<8x64xf32>
    %1 = arith.truncf %0 : vector<8x64xf32> to vector<8x64xbf16>
    %c0_1 = arith.constant 0 : index
    %c0_2 = arith.constant 0 : index
    %2 = vector.load %arg2[%c0_1, %c0_2] : memref<64x128xbf16, #tpu.memory_space<vmem>>, vector<64x128xbf16>
    %cst = arith.constant dense<0.000000e+00> : vector<8x128xf32>
    %3 = tpu.matmul %1, %2, %cst {dimension_numbers = #tpu.dot_dimension_numbers<[1], [0], [0], [1], [0, 0, 1, 1], [], []>} : vector<8x64xbf16>, vector<64x128xbf16>, vector<8x128xf32> -> vector<8x128xf32>
    %c0_3 = arith.constant 0 : index
    %c0_4 = arith.constant 0 : index
    %4 = vector.load %arg3[%c0_3, %c0_4] : memref<1x128xf32, #tpu.memory_space<vmem>>, vector<1x128xf32>
    %5 = vector.broadcast %4 : vector<1x128xf32> to vector<8x128xf32>
    %6 = arith.addf %3, %5 : vector<8x128xf32>
    %cst_5 = arith.constant 0.000000e+00 : f32
    %7 = vector.broadcast %cst_5 : f32 to vector<8x128xf32>
    %8 = arith.maximumf %6, %7 : vector<8x128xf32>
    %9 = arith.truncf %8 : vector<8x128xf32> to vector<8x128xbf16>
    %c0_6 = arith.constant 0 : index
    %c0_7 = arith.constant 0 : index
    %10 = vector.load %arg6[%c0_6, %c0_7] : memref<8x128xbf16, #tpu.memory_space<vmem>>, vector<8x128xbf16>
    tpu.vector_store %arg6[%c0_6, %c0_7], %9 {strides = array<i32>} : memref<8x128xbf16, #tpu.memory_space<vmem>>, vector<8x128xbf16>,
    %11 = arith.truncf %8 : vector<8x128xf32> to vector<8x128xbf16>
    %c0_8 = arith.constant 0 : index
    %c0_9 = arith.constant 0 : index
    %12 = vector.load %arg4[%c0_8, %c0_9] : memref<128x64xbf16, #tpu.memory_space<vmem>>, vector<128x64xbf16>
    %cst_10 = arith.constant dense<0.000000e+00> : vector<8x64xf32>
    %13 = tpu.matmul %11, %12, %cst_10 {dimension_numbers = #tpu.dot_dimension_numbers<[1], [0], [0], [1], [0, 0, 1, 1], [], []>} : vector<8x128xbf16>, vector<128x64xbf16>, vector<8x64xf32> -> vector<8x64xf32>
    %c0_11 = arith.constant 0 : index
    %c0_12 = arith.constant 0 : index
    %14 = vector.load %arg5[%c0_11, %c0_12] : memref<1x64xf32, #tpu.memory_space<vmem>>, vector<1x64xf32>
    %15 = vector.broadcast %14 : vector<1x64xf32> to vector<8x64xf32>
    %16 = arith.addf %13, %15 : vector<8x64xf32>
    %c0_13 = arith.constant 0 : index
    %c0_14 = arith.constant 0 : index
    %17 = vector.load %arg7[%c0_13, %c0_14] : memref<8x64xf32, #tpu.memory_space<vmem>>, vector<8x64xf32>
    tpu.vector_store %arg7[%c0_13, %c0_14], %16 {strides = array<i32>} : memref<8x64xf32, #tpu.memory_space<vmem>>, vector<8x64xf32>,
    return
  }
  func.func @transform_0(%arg0: i32) -> (i32, i32) {
    %c0_i32 = arith.constant 0 : i32
    %c0_i32_0 = arith.constant 0 : i32
    return %arg0, %c0_i32 : i32, i32
  }
  func.func @transform_1(%arg0: i32) -> (i32, i32) {
    %c0_i32 = arith.constant 0 : i32
    %c0_i32_0 = arith.constant 0 : i32
    %c0_i32_1 = arith.constant 0 : i32
    return %c0_i32, %c0_i32_0 : i32, i32
  }
  func.func @transform_2(%arg0: i32) -> (i32, i32) {
    %c0_i32 = arith.constant 0 : i32
    %c0_i32_0 = arith.constant 0 : i32
    %c0_i32_1 = arith.constant 0 : i32
    return %c0_i32, %c0_i32_0 : i32, i32
  }
  func.func @transform_3(%arg0: i32) -> (i32, i32) {
    %c0_i32 = arith.constant 0 : i32
    %c0_i32_0 = arith.constant 0 : i32
    %c0_i32_1 = arith.constant 0 : i32
    return %c0_i32, %c0_i32_0 : i32, i32
  }
  func.func @transform_4(%arg0: i32) -> (i32, i32) {
    %c0_i32 = arith.constant 0 : i32
    %c0_i32_0 = arith.constant 0 : i32
    %c0_i32_1 = arith.constant 0 : i32
    return %c0_i32, %c0_i32_0 : i32, i32
  }
  func.func @transform_5(%arg0: i32) -> (i32, i32) {
    %c0_i32 = arith.constant 0 : i32
    %c0_i32_0 = arith.constant 0 : i32
    return %arg0, %c0_i32 : i32, i32
  }
  func.func @transform_6(%arg0: i32) -> (i32, i32) {
    %c0_i32 = arith.constant 0 : i32
    %c0_i32_0 = arith.constant 0 : i32
    return %arg0, %c0_i32 : i32, i32
  }
}

</mosaic_0001>

<bundles_post_ra>
// kernel: tpu_custom_call.1
= control target key start
LH: loop header
LB: loop body
LE: loop exit
PB: predicated region body
PF: predicated region fallthrough
CT: control target
= control target key end

     0   :  { %12 = vsyncpa [#allocation3], 0  ;;  %v374_v1 = vmov 0.0   ;;  %vm375_vm0 = vmmov 0   ;;  %s466_s0 = inlined_call_operand.vmem [shape: f32[8,64], index: 0, kind: input, shape index: {}]   ;;  %s467_s1 = inlined_call_operand.vmem [shape: bf16[64,128], index: 1, kind: input, shape index: {}]   ;;  %s468_s2 = inlined_call_operand.vmem [shape: f32[1,128], index: 2, kind: input, shape index: {}]   ;;  %s469_s3 = inlined_call_operand.vmem [shape: bf16[128,64], index: 3, kind: input, shape index: {}]   ;;  %s470_s4 = inlined_call_operand.vmem [shape: f32[1,64], index: 4, kind: input, shape index: {}]   ;;  %s471_s5 = inlined_call_operand.hbm [shape: bf16[8,128], index: 5, kind: output, shape index: {0}]   ;;  %s472_s6 = inlined_call_operand.hbm [shape: f32[8,64], index: 6, kind: output, shape index: {1}]  }
   0x1   :  { %v318_v0 = vld [vmem:[%s467_s1 + $0x18] sm:$0xff]   ;;  %282 = vmatprep.subr.bf16.mxu0 %v374_v1  ;;  %294 = vmatprep.subr.bf16.mxu1 %v374_v1  ;;  %v319_v2 = vld [vmem:[%s467_s1 + $0x10] sm:$0xff]   ;;  %v320_v4 = vld [vmem:[%s467_s1 + $0x8] sm:$0xff]  }
   0x2   :  { %283 = vmatpush3.bf16.msra.mxu0 %v318_v0  ;;  %290 = vmatprep.mubr.msk.bf16.mxu0 %vm375_vm0, %v374_v1  ;;  %v322_v3 = vld [vmem:[%s469_s3 + $0x38] sm:$0xff]   ;;  %v323_v5 = vld [vmem:[%s469_s3 + $0x30] sm:$0xff]   ;;  %v321_v6 = vld [vmem:[%s467_s1] sm:$0xff]  }
   0x3   :  { %284 = vmatprep.subr.bf16.mxu0 %v374_v1  ;;  %310 = vmatprep.mubr.msk.bf16.mxu1 %vm375_vm0, %v374_v1  ;;  %v25_v7 = vld [vmem:[%s466_s0] sm:$0xff]  ;;  %v324_v8 = vld [vmem:[%s469_s3 + $0x28] sm:$0xff]  }
   0x4   :  { %295 = vmatpush3.bf16.msra.mxu1 %v322_v3 }
   0x5   :  { %296 = vmatprep.subr.bf16.mxu1 %v374_v1 }
   0x6   :  { %285 = vmatpush3.bf16.msra.mxu0 %v319_v2 }
   0x7   :  { %286 = vmatprep.subr.bf16.mxu0 %v374_v1 }
   0x8   :  { %297 = vmatpush3.bf16.msra.mxu1 %v323_v5 }
   0x9   :  { %298 = vmatprep.subr.bf16.mxu1 %v374_v1 }
   0xa   :  { %287 = vmatpush3.bf16.msra.mxu0 %v320_v4 }
   0xb   :  { %288 = vmatprep.subr.bf16.mxu0 %v374_v1 }
   0xc   :  { %13 = vsyncpa [#allocation5], 0  ;;  %v26_v9 = vpack.c.bf16 %v25_v7, %v25_v7  ;;  %vm66_vm1 = vcmask 523264   ;;  %299 = vmatpush3.bf16.msra.mxu1 %v324_v8  ;;  %v325_v10 = vld [vmem:[%s469_s3 + $0x20] sm:$0xff]   ;;  %v326_v11 = vld [vmem:[%s469_s3 + $0x18] sm:$0xff]   ;;  %s376_s23 = smov [#allocation2]  }
   0xd   :  { %300 = vmatprep.subr.bf16.mxu1 %v374_v1  ;;  %v327_v12 = vld [vmem:[%s469_s3 + $0x10] sm:$0xff]   ;;  %v328_v13 = vld [vmem:[%s469_s3 + $0x8] sm:$0xff]   ;;  %v329_v14 = vld [vmem:[%s469_s3] sm:$0xff]   ;;  %s231_s24 = sshll.u32 %s376_s23, 4  ;;  %s232_s24 = int_to_ptr.vmem [resolvable:$true] %s231_s24 }
   0xe   :  { %289 = vmatpush3.bf16.msra.mxu0 %v321_v6  ;;  %v253_v15 = vld [vmem:[%s468_s2] ss:$0 sm:$0xff]  ;;  %s330_s25 = scalar_lea.vmem %s232_s24, 64  ;;  %p335_p1 = scmp.lt.s32.totalorder %s232_s24, %s232_s24 }
   0xf   :  { %p331_p0 = scmp.ne.s32.totalorder %s232_s24, %s330_s25  ;;  %p336_p2 = scmp.lt.s32.totalorder %s330_s25, %s330_s25 }
  0x10   :  { %301 = vmatpush3.bf16.msra.mxu1 %v325_v10 }
  0x11   :  { %291 = vmatmul.mubr.msk.bf16.vlgmr.msra.gmra.mxu0 %vm66_vm1, %v26_v9  ;;  %302 = vmatprep.subr.bf16.mxu1 %v374_v1  ;;  %p337_p3 = por %p336_p2, %p335_p1 }
  0x13   :  { %p338_p4 = pnand %p337_p3, %p331_p0 }
  0x14   :  { %303 = vmatpush3.bf16.msra.mxu1 %v326_v11 }
  0x15   :  { %304 = vmatprep.subr.bf16.mxu1 %v374_v1 }
  0x18   :  { %305 = vmatpush3.bf16.msra.mxu1 %v327_v12 }
  0x19   :  { %306 = vmatprep.subr.bf16.mxu1 %v374_v1 }
  0x1c   :  { %307 = vmatpush3.bf16.msra.mxu1 %v328_v13 }
  0x1d   :  { %308 = vmatprep.subr.bf16.mxu1 %v374_v1 }
  0x20   :  { %309 = vmatpush3.bf16.msra.mxu1 %v329_v14 }
  0xd1   :  { %v104_v16 = vpop.f32.mrf.mxu0 }
  0xd2   :  { %v105_v17 = vadd.f32 %v253_v15, %v104_v16 }
  0xd3   :  { %v292_v18 = vpop.f32.mrf.mxu0 }
  0xd4   :  { %v110_v19 = vmax.f32 %v105_v17, 0.0 }
  0xd5   :  { %v107_v20 = vpop.f32.mrf.mxu0 }
  0xd6   :  { %v111_v21 = vpack.c.bf16 %v110_v19, %v110_v19 }
  0xd7   :  { %v293_v22 = vpop.f32.mrf.mxu0 }
  0xd8   :  { %112 = vst [vmem:[#allocation2] sm:$0xf] %v111_v21  ;;  %311 = vmatmul.mubr.bf16.vlgmr.msra.gmra.mxu1 %v111_v21 }
  0xd9   :  { %341 = shalt.err (!%p338_p4)
}
  0xda   :  { %234 = dma.vmem_to_hbm [thread:$0]  %s232_s24, 64, %s471_s5, [#allocation3]   ;;  %v259_v23 = vld [vmem:[%s470_s4] ss:$0 sm:$0xff] }
  0xdb   :  { %s377_s28 = smov [#allocation4]  }
  0xdc   :  { %s241_s29 = sshll.u32 %s377_s28, 4  ;;  %s242_s29 = int_to_ptr.vmem [resolvable:$true] %s241_s29 }
  0xdd   :  { %s350_s30 = scalar_lea.vmem %s242_s29, 128  ;;  %p355_p6 = scmp.lt.s32.totalorder %s242_s29, %s242_s29 }
  0xde   :  { %p351_p5 = scmp.ne.s32.totalorder %s242_s29, %s350_s30  ;;  %p356_p7 = scmp.lt.s32.totalorder %s350_s30, %s350_s30 }
  0xe0   :  { %p357_p8 = por %p356_p7, %p355_p6 }
  0xe2   :  { %p358_p9 = pnand %p357_p8, %p351_p5 }
 0x198   :  { %v218_v24 = vpop.f32.mrf.mxu1 }
 0x199   :  { %v219_v25 = vadd.f32 %v259_v23, %v218_v24 }
 0x19a   :  { %v312_v26 = vpop.f32.mrf.mxu1 }
 0x19b   :  { %224 = vst.msk [vmem:[#allocation4] sm:$0xff] %vm66_vm1, %v219_v25 }
 0x19c   :  { %v221_v27 = vpop.f32.mrf.mxu1 }
 0x19d   :  { %361 = shalt.err (!%p358_p9)
}
 0x19e   :  { %244 = dma.vmem_to_hbm [thread:$0]  %s242_s29, 128, %s472_s6, [#allocation5]   ;;  %v313_v28 = vpop.f32.mrf.mxu1 }
 0x19f   :  { %370 = dma.done.wait [#allocation3], 64  }
 0x1a0   :  { %371 = vsyncadd [#allocation3], 4294967232 }
 0x1a1   :  { %372 = dma.done.wait [#allocation5], 128  }
 0x1a2   :  { %373 = vsyncadd [#allocation5], 4294967168 }
 0x1a3   :  { %251 = vsyncpa [#allocation3], 1 }
 0x1a4   :  { %252 = vsyncpa [#allocation5], 1 }

</bundles_post_ra>
